<compile_context>
chip_gen: v6e
topology: v6e:2x2x1
jax: 0.10.0
libtpu: 0.0.40
codegen_flags: <defaults>
</compile_context>

<pallas_src>
import jax
import jax.numpy as jnp
from jax.experimental import pallas as pl
from jax.experimental.pallas import tpu as pltpu


# ----------------------------------------------------------------------------
# Kernel
# ----------------------------------------------------------------------------
def _critic_kernel(s_ref, a_ref, w1s_ref, w1a_ref, b1_ref,
                   w2_ref, b2_ref, w3_ref, b3_ref, o_ref):
    # Layer 1: concat(state, action) @ W1  ==  state @ W1[:sd] + action @ W1[sd:]
    s = s_ref[...].astype(jnp.bfloat16)                               # (TB, sd)
    a = a_ref[...].astype(jnp.bfloat16)                               # (TB, A)
    h1 = jnp.dot(s, w1s_ref[...], preferred_element_type=jnp.float32)
    h1 = h1 + jnp.dot(a, w1a_ref[...], preferred_element_type=jnp.float32)
    h1 = jnp.maximum(h1 + b1_ref[...], 0.0)                           # f32 ReLU, (TB, H)

    # Layer 2: MXU matmul, bf16 operands, f32 accumulate.
    h2 = jnp.dot(h1.astype(jnp.bfloat16), w2_ref[...],
                 preferred_element_type=jnp.float32)
    h2 = jnp.maximum(h2 + b2_ref[...], 0.0)                           # (TB, H)

    # Layer 3: (H -> 1) as VPU multiply + XLU lane reduction (no N=1 matmul).
    out = jnp.sum(h2 * w3_ref[...], axis=-1, keepdims=True) + b3_ref[...]
    o_ref[...] = out.astype(o_ref.dtype)                              # (TB, 1)


# ----------------------------------------------------------------------------
# Wrapper
# ----------------------------------------------------------------------------
def critic_forward(state, action, params, *, batch_tile=256):
    """state: (B, state_dim) f32, action: (B, num_agents*action_dim) f32."""
    w1s, w1a, b1, w2, b2, w3, b3 = params
    B, sd = state.shape
    A = action.shape[1]
    H = w2.shape[1]                                                   # padded hidden (128)

    # Batch tile: full batch if small, else 256-row tiles (8-divisible).
    TB = B if B <= batch_tile else batch_tile
    grid = (pl.cdiv(B, TB),)

    row = lambda shape: pl.BlockSpec(shape, lambda i: (i, 0))         # batch-tiled
    rep = lambda shape: pl.BlockSpec(shape, lambda i: (0, 0))         # resident (weights)

    return pl.pallas_call(
        _critic_kernel,
        out_shape=jax.ShapeDtypeStruct((B, 1), jnp.float32),
        grid=grid,
        in_specs=[
            row((TB, sd)),            # state
            row((TB, A)),             # action
            rep((sd, H)),             # w1 (state rows), bf16
            rep((A, H)),              # w1 (action rows), bf16
            rep((1, H)),              # b1, f32
            rep((H, H)),              # w2, bf16
            rep((1, H)),              # b2, f32
            rep((1, H)),              # w3 stored as a row, f32
            rep((1, 1)),              # b3, f32
        ],
        out_specs=row((TB, 1)),
        compiler_params=pltpu.CompilerParams(
            dimension_semantics=("parallel",),        # shard batch tiles across TCs (v7x)
            vmem_limit_bytes=16 * 1024 * 1024,        # real footprint is << 1 MiB + slack
        ),
    )(state, action, w1s, w1a, b1, w2, b2, w3, b3)


# ----------------------------------------------------------------------------
# Parameter init (matches nn.Linear default init; weights stored (in, out))
# ----------------------------------------------------------------------------
def init_critic_params(key, state_dim, action_dim, num_agents,
                       hidden=120, hidden_pad=128):
    """Returns (kernel_params, raw_params).

    kernel_params: hidden padded to 128 with zeros (math unchanged), w1 split
                   into state/action rows, matmul weights cast to bf16.
    raw_params:    f32, unpadded -- exactly the PyTorch module's parameters.
    """
    A = num_agents * action_dim
    in_dim = state_dim + A
    k = jax.random.split(key, 6)

    def uni(k_, shape, fan_in):
        bound = 1.0 / jnp.sqrt(jnp.float32(fan_in))
        return jax.random.uniform(k_, shape, jnp.float32, -bound, bound)

    w1 = uni(k[0], (in_dim, hidden), in_dim)
    b1 = uni(k[1], (hidden,), in_dim)
    w2 = uni(k[2], (hidden, hidden), hidden)
    b2 = uni(k[3], (hidden,), hidden)
    w3 = uni(k[4], (hidden,), hidden)          # logical (hidden, 1), kept as a row
    b3 = uni(k[5], (1,), hidden)

    raw = (w1, b1, w2, b2, w3, b3)

    pad = hidden_pad - hidden
    w1p = jnp.pad(w1, ((0, 0), (0, pad)))
    b1p = jnp.pad(b1, ((0, pad),)).reshape(1, hidden_pad)
    w2p = jnp.pad(w2, ((0, pad), (0, pad)))
    b2p = jnp.pad(b2, ((0, pad),)).reshape(1, hidden_pad)
    w3p = jnp.pad(w3, ((0, pad),)).reshape(1, hidden_pad)
    b3p = b3.reshape(1, 1)

    kern = (
        w1p[:state_dim].astype(jnp.bfloat16),   # w1_s (sd, Hp)
        w1p[state_dim:].astype(jnp.bfloat16),   # w1_a (A, Hp)
        b1p,                                    # (1, Hp) f32
        w2p.astype(jnp.bfloat16),               # (Hp, Hp)
        b2p,                                    # (1, Hp) f32
        w3p,                                    # (1, Hp) f32 (VPU path)
        b3p,                                    # (1, 1) f32
    )
    return kern, raw


# ----------------------------------------------------------------------------
# References
# ----------------------------------------------------------------------------
def _reference_kernel_math(state, action, params):
    """Same math as the kernel (bf16 matmul operands, f32 accumulate)."""
    w1s, w1a, b1, w2, b2, w3, b3 = params
    s = state.astype(jnp.bfloat16)
    a = action.astype(jnp.bfloat16)
    h1 = (jnp.dot(s, w1s, preferred_element_type=jnp.float32)
          + jnp.dot(a, w1a, preferred_element_type=jnp.float32) + b1)
    h1 = jnp.maximum(h1, 0.0)
    h2 = jnp.dot(h1.astype(jnp.bfloat16), w2,
                 preferred_element_type=jnp.float32) + b2
    h2 = jnp.maximum(h2, 0.0)
    return jnp.sum(h2 * w3, axis=-1, keepdims=True) + b3


def _reference_module(state, action, raw):
    """Exact f32 semantics of the PyTorch Critic module."""
    w1, b1, w2, b2, w3, b3 = raw
    x = jnp.concatenate([state, action], axis=-1)
    h1 = jnp.maximum(x @ w1 + b1, 0.0)
    h2 = jnp.maximum(h1 @ w2 + b2, 0.0)
    return h2 @ w3[:, None] + b3


# ----------------------------------------------------------------------------
# Demo / self-check
# ----------------------------------------------------------------------------
if __name__ == "__main__":
    state_dim, action_dim, num_agents, batch = 10, 4, 3, 8

    key = jax.random.PRNGKey(0)
    k_s, k_a, k_p = jax.random.split(key, 3)
    state = jax.random.normal(k_s, (batch, state_dim), jnp.float32)
    action = jax.random.normal(k_a, (batch, num_agents * action_dim), jnp.float32)
    kern_params, raw_params = init_critic_params(k_p, state_dim, action_dim, num_agents)

    out = critic_forward(state, action, kern_params)
    out = jax.block_until_ready(out)

    ref_k = _reference_kernel_math(state, action, kern_params)   # same-math check
    ref_m = _reference_module(state, action, raw_params)         # f32 module semantics

    assert out.shape == (batch, 1)
    assert jnp.allclose(out, ref_k, atol=1e-3, rtol=1e-3)
    assert jnp.allclose(out, ref_m, atol=1e-1, rtol=1e-1)        # bf16-matmul tolerance
    print("KERNEL_OK")
</pallas_src>

<mosaic_0001>
module attributes {stable_mosaic.version = 11 : i64} {
  func.func @_critic_kernel(%arg0: i32, %arg1: memref<8x10xf32, #tpu.memory_space<vmem>>, %arg2: memref<8x12xf32, #tpu.memory_space<vmem>>, %arg3: memref<10x128xbf16, #tpu.memory_space<vmem>>, %arg4: memref<12x128xbf16, #tpu.memory_space<vmem>>, %arg5: memref<1x128xf32, #tpu.memory_space<vmem>>, %arg6: memref<128x128xbf16, #tpu.memory_space<vmem>>, %arg7: memref<1x128xf32, #tpu.memory_space<vmem>>, %arg8: memref<1x128xf32, #tpu.memory_space<vmem>>, %arg9: memref<1x1xf32, #tpu.memory_space<vmem>>, %arg10: memref<8x1xf32, #tpu.memory_space<vmem>>) attributes {dimension_semantics = [#tpu.dimension_semantics<parallel>], iteration_bounds = array<i64: 1>, scalar_prefetch = 0 : i64, scratch_operands = 0 : i64, tpu.core_type = #tpu.core_type<tc>, window_params = [{transform_indices = @transform_0, window_bounds = array<i64: 8, 10>}, {transform_indices = @transform_1, window_bounds = array<i64: 8, 12>}, {pipeline_mode = #tpu.pipeline_mode<synchronous>, transform_indices = @transform_2, window_bounds = array<i64: 10, 128>}, {pipeline_mode = #tpu.pipeline_mode<synchronous>, transform_indices = @transform_3, window_bounds = array<i64: 12, 128>}, {pipeline_mode = #tpu.pipeline_mode<synchronous>, transform_indices = @transform_4, window_bounds = array<i64: 1, 128>}, {pipeline_mode = #tpu.pipeline_mode<synchronous>, transform_indices = @transform_5, window_bounds = array<i64: 128, 128>}, {pipeline_mode = #tpu.pipeline_mode<synchronous>, transform_indices = @transform_6, window_bounds = array<i64: 1, 128>}, {pipeline_mode = #tpu.pipeline_mode<synchronous>, transform_indices = @transform_7, window_bounds = array<i64: 1, 128>}, {pipeline_mode = #tpu.pipeline_mode<synchronous>, transform_indices = @transform_8, window_bounds = array<i64: 1, 1>}, {transform_indices = @transform_9, window_bounds = array<i64: 8, 1>}]} {
    %c0 = arith.constant 0 : index
    %c0_0 = arith.constant 0 : index
    %0 = vector.load %arg1[%c0, %c0_0] : memref<8x10xf32, #tpu.memory_space<vmem>>, vector<8x10xf32>
    %1 = arith.truncf %0 : vector<8x10xf32> to vector<8x10xbf16>
    %c0_1 = arith.constant 0 : index
    %c0_2 = arith.constant 0 : index
    %2 = vector.load %arg2[%c0_1, %c0_2] : memref<8x12xf32, #tpu.memory_space<vmem>>, vector<8x12xf32>
    %3 = arith.truncf %2 : vector<8x12xf32> to vector<8x12xbf16>
    %c0_3 = arith.constant 0 : index
    %c0_4 = arith.constant 0 : index
    %4 = vector.load %arg3[%c0_3, %c0_4] : memref<10x128xbf16, #tpu.memory_space<vmem>>, vector<10x128xbf16>
    %cst = arith.constant dense<0.000000e+00> : vector<8x128xf32>
    %5 = tpu.matmul %1, %4, %cst {dimension_numbers = #tpu.dot_dimension_numbers<[1], [0], [0], [1], [0, 0, 1, 1], [], []>} : vector<8x10xbf16>, vector<10x128xbf16>, vector<8x128xf32> -> vector<8x128xf32>
    %c0_5 = arith.constant 0 : index
    %c0_6 = arith.constant 0 : index
    %6 = vector.load %arg4[%c0_5, %c0_6] : memref<12x128xbf16, #tpu.memory_space<vmem>>, vector<12x128xbf16>
    %cst_7 = arith.constant dense<0.000000e+00> : vector<8x128xf32>
    %7 = tpu.matmul %3, %6, %cst_7 {dimension_numbers = #tpu.dot_dimension_numbers<[1], [0], [0], [1], [0, 0, 1, 1], [], []>} : vector<8x12xbf16>, vector<12x128xbf16>, vector<8x128xf32> -> vector<8x128xf32>
    %8 = arith.addf %5, %7 : vector<8x128xf32>
    %c0_8 = arith.constant 0 : index
    %c0_9 = arith.constant 0 : index
    %9 = vector.load %arg5[%c0_8, %c0_9] : memref<1x128xf32, #tpu.memory_space<vmem>>, vector<1x128xf32>
    %10 = vector.broadcast %9 : vector<1x128xf32> to vector<8x128xf32>
    %11 = arith.addf %8, %10 : vector<8x128xf32>
    %cst_10 = arith.constant 0.000000e+00 : f32
    %12 = vector.broadcast %cst_10 : f32 to vector<8x128xf32>
    %13 = arith.maximumf %11, %12 : vector<8x128xf32>
    %14 = arith.truncf %13 : vector<8x128xf32> to vector<8x128xbf16>
    %c0_11 = arith.constant 0 : index
    %c0_12 = arith.constant 0 : index
    %15 = vector.load %arg6[%c0_11, %c0_12] : memref<128x128xbf16, #tpu.memory_space<vmem>>, vector<128x128xbf16>
    %cst_13 = arith.constant dense<0.000000e+00> : vector<8x128xf32>
    %16 = tpu.matmul %14, %15, %cst_13 {dimension_numbers = #tpu.dot_dimension_numbers<[1], [0], [0], [1], [0, 0, 1, 1], [], []>} : vector<8x128xbf16>, vector<128x128xbf16>, vector<8x128xf32> -> vector<8x128xf32>
    %c0_14 = arith.constant 0 : index
    %c0_15 = arith.constant 0 : index
    %17 = vector.load %arg7[%c0_14, %c0_15] : memref<1x128xf32, #tpu.memory_space<vmem>>, vector<1x128xf32>
    %18 = vector.broadcast %17 : vector<1x128xf32> to vector<8x128xf32>
    %19 = arith.addf %16, %18 : vector<8x128xf32>
    %cst_16 = arith.constant 0.000000e+00 : f32
    %20 = vector.broadcast %cst_16 : f32 to vector<8x128xf32>
    %21 = arith.maximumf %19, %20 : vector<8x128xf32>
    %c0_17 = arith.constant 0 : index
    %c0_18 = arith.constant 0 : index
    %22 = vector.load %arg8[%c0_17, %c0_18] : memref<1x128xf32, #tpu.memory_space<vmem>>, vector<1x128xf32>
    %23 = vector.broadcast %22 : vector<1x128xf32> to vector<8x128xf32>
    %24 = arith.mulf %21, %23 : vector<8x128xf32>
    %cst_19 = arith.constant dense<0.000000e+00> : vector<8xf32>
    %25 = vector.multi_reduction <add>, %24, %cst_19 [1] : vector<8x128xf32> to vector<8xf32>
    %26 = vector.shape_cast %25 : vector<8xf32> to vector<8x1xf32>
    %c0_20 = arith.constant 0 : index
    %c0_21 = arith.constant 0 : index
    %27 = vector.load %arg9[%c0_20, %c0_21] : memref<1x1xf32, #tpu.memory_space<vmem>>, vector<1x1xf32>
    %28 = vector.broadcast %27 : vector<1x1xf32> to vector<8x1xf32>
    %29 = arith.addf %26, %28 : vector<8x1xf32>
    %c0_22 = arith.constant 0 : index
    %c0_23 = arith.constant 0 : index
    %30 = vector.load %arg10[%c0_22, %c0_23] : memref<8x1xf32, #tpu.memory_space<vmem>>, vector<8x1xf32>
    tpu.vector_store %arg10[%c0_22, %c0_23], %29 {strides = array<i32>} : memref<8x1xf32, #tpu.memory_space<vmem>>, vector<8x1xf32>,
    return
  }
  func.func @transform_0(%arg0: i32) -> (i32, i32) {
    %c0_i32 = arith.constant 0 : i32
    %c0_i32_0 = arith.constant 0 : i32
    return %arg0, %c0_i32 : i32, i32
  }
  func.func @transform_1(%arg0: i32) -> (i32, i32) {
    %c0_i32 = arith.constant 0 : i32
    %c0_i32_0 = arith.constant 0 : i32
    return %arg0, %c0_i32 : i32, i32
  }
  func.func @transform_2(%arg0: i32) -> (i32, i32) {
    %c0_i32 = arith.constant 0 : i32
    %c0_i32_0 = arith.constant 0 : i32
    %c0_i32_1 = arith.constant 0 : i32
    return %c0_i32, %c0_i32_0 : i32, i32
  }
  func.func @transform_3(%arg0: i32) -> (i32, i32) {
    %c0_i32 = arith.constant 0 : i32
    %c0_i32_0 = arith.constant 0 : i32
    %c0_i32_1 = arith.constant 0 : i32
    return %c0_i32, %c0_i32_0 : i32, i32
  }
  func.func @transform_4(%arg0: i32) -> (i32, i32) {
    %c0_i32 = arith.constant 0 : i32
    %c0_i32_0 = arith.constant 0 : i32
    %c0_i32_1 = arith.constant 0 : i32
    return %c0_i32, %c0_i32_0 : i32, i32
  }
  func.func @transform_5(%arg0: i32) -> (i32, i32) {
    %c0_i32 = arith.constant 0 : i32
    %c0_i32_0 = arith.constant 0 : i32
    %c0_i32_1 = arith.constant 0 : i32
    return %c0_i32, %c0_i32_0 : i32, i32
  }
  func.func @transform_6(%arg0: i32) -> (i32, i32) {
    %c0_i32 = arith.constant 0 : i32
    %c0_i32_0 = arith.constant 0 : i32
    %c0_i32_1 = arith.constant 0 : i32
    return %c0_i32, %c0_i32_0 : i32, i32
  }
  func.func @transform_7(%arg0: i32) -> (i32, i32) {
    %c0_i32 = arith.constant 0 : i32
    %c0_i32_0 = arith.constant 0 : i32
    %c0_i32_1 = arith.constant 0 : i32
    return %c0_i32, %c0_i32_0 : i32, i32
  }
  func.func @transform_8(%arg0: i32) -> (i32, i32) {
    %c0_i32 = arith.constant 0 : i32
    %c0_i32_0 = arith.constant 0 : i32
    %c0_i32_1 = arith.constant 0 : i32
    return %c0_i32, %c0_i32_0 : i32, i32
  }
  func.func @transform_9(%arg0: i32) -> (i32, i32) {
    %c0_i32 = arith.constant 0 : i32
    %c0_i32_0 = arith.constant 0 : i32
    return %arg0, %c0_i32 : i32, i32
  }
}

</mosaic_0001>

<bundles_post_ra>
// kernel: tpu_custom_call.1
= control target key start
LH: loop header
LB: loop body
LE: loop exit
PB: predicated region body
PF: predicated region fallthrough
CT: control target
= control target key end

     0   :  { %s649_s0 = inlined_call_operand.hbm [shape: f32[8,10], index: 0, kind: input, shape index: {}]   ;;  %s650_s1 = inlined_call_operand.hbm [shape: f32[8,12], index: 1, kind: input, shape index: {}]   ;;  %s651_s2 = inlined_call_operand.hbm [shape: bf16[10,128], index: 2, kind: input, shape index: {}]   ;;  %s652_s3 = inlined_call_operand.hbm [shape: bf16[12,128], index: 3, kind: input, shape index: {}]   ;;  %s653_s4 = inlined_call_operand.vmem [shape: f32[1,128], index: 4, kind: input, shape index: {}]   ;;  %s654_s5 = inlined_call_operand.hbm [shape: bf16[128,128], index: 5, kind: input, shape index: {}]   ;;  %s655_s6 = inlined_call_operand.vmem [shape: f32[1,128], index: 6, kind: input, shape index: {}]   ;;  %s656_s7 = inlined_call_operand.vmem [shape: f32[1,128], index: 7, kind: input, shape index: {}]   ;;  %s657_s8 = inlined_call_operand.<no memory space> [shape: f32[1,1], index: 8, kind: input, shape index: {}]   ;;  %s658_s9 = inlined_call_operand.vmem [shape: f32[8,1], index: 9, kind: output, shape index: {}]  }
   0x1   :  { %v14_v0 = vstv %s657_s8 }
   0x2   :  { %15 = vst [vmem:[#allocation2] sm:$0x1] %v14_v0 }
   0x3   :  { %16 = vsyncpa [#allocation4], 0 }
   0x4   :  { %17 = vsyncpa [#allocation6], 0 }
   0x5   :  { %18 = vsyncpa [#allocation9], 0  ;;  %s548_s11 = smov [#allocation5]  }
   0x6   :  { %s35_s12 = sshll.u32 %s548_s11, 4  ;;  %s36_s12 = int_to_ptr.vmem [resolvable:$true] %s35_s12 }
   0x7   :  { %s450_s13 = scalar_lea.vmem %s36_s12, 128  ;;  %p455_p1 = scmp.lt.s32.totalorder %s36_s12, %s36_s12 }
   0x8   :  { %p451_p0 = scmp.ne.s32.totalorder %s36_s12, %s450_s13  ;;  %p456_p2 = scmp.lt.s32.totalorder %s450_s13, %s450_s13 }
   0xa   :  { %p457_p3 = por %p456_p2, %p455_p1 }
   0xc   :  { %p458_p4 = pnand %p457_p3, %p451_p0 }
   0xe   :  { %461 = shalt.err (!%p458_p4)
}
   0xf   :  { %38 = dma.hbm_to_vmem [thread:$0]  %s650_s1, 128, %s36_s12, [#allocation6]  }
  0x10   :  { %s549_s16 = smov [#allocation8]   ;;  %s550_s17 = smov [#allocation3]  }
  0x11   :  { %s56_s8 = sshll.u32 %s549_s16, 4  ;;  %s25_s18 = sshll.u32 %s550_s17, 4  ;;  %s57_s8 = int_to_ptr.vmem [resolvable:$true] %s56_s8  ;;  %s26_s18 = int_to_ptr.vmem [resolvable:$true] %s25_s18 }
  0x12   :  { %s470_s19 = scalar_lea.vmem %s57_s8, 128  ;;  %p475_p6 = scmp.lt.s32.totalorder %s57_s8, %s57_s8 }
  0x13   :  { %p471_p5 = scmp.ne.s32.totalorder %s57_s8, %s470_s19  ;;  %p476_p7 = scmp.lt.s32.totalorder %s470_s19, %s470_s19 }
  0x15   :  { %p477_p8 = por %p476_p7, %p475_p6 }
  0x17   :  { %p478_p9 = pnand %p477_p8, %p471_p5 }
  0x19   :  { %481 = shalt.err (!%p478_p9)
}
  0x1a   :  { %s551_s20 = smov 64   ;;  %s552_s21 = smov 4  }
  0x1b   :  { %62 = dma.hbm_to_vmem [thread:$0]  %s652_s3, 128, %s57_s8, [#allocation9], %s551_s20, %s551_s20, %s552_s21  }
  0x1c   :  { %s490_s1 = scalar_lea.vmem %s26_s18, 128  ;;  %p495_p11 = scmp.lt.s32.totalorder %s26_s18, %s26_s18 }
  0x1d   :  { %p491_p10 = scmp.ne.s32.totalorder %s26_s18, %s490_s1  ;;  %p496_p12 = scmp.lt.s32.totalorder %s490_s1, %s490_s1 }
  0x1f   :  { %p497_p13 = por %p496_p12, %p495_p11 }
  0x21   :  { %p498_p0 = pnand %p497_p13, %p491_p10 }
  0x23   :  { %501 = shalt.err (!%p498_p0)
}
  0x24   :  { %28 = dma.hbm_to_vmem [thread:$0]  %s649_s0, 128, %s26_s18, [#allocation4]  }
  0x25   :  { %s553_s26 = smov [#allocation7]   ;;  %s554_s28 = smov [#allocation10]  }
  0x26   :  { %s44_s27 = sshll.u32 %s553_s26, 4  ;;  %s70_s29 = sshll.u32 %s554_s28, 4  ;;  %s45_s27 = int_to_ptr.vmem [resolvable:$true] %s44_s27  ;;  %s71_s29 = int_to_ptr.vmem [resolvable:$true] %s70_s29 }
  0x27   :  { %s510_s30 = scalar_lea.vmem %s45_s27, 128  ;;  %p515_p2 = scmp.lt.s32.totalorder %s45_s27, %s45_s27 }
  0x28   :  { %p511_p1 = scmp.ne.s32.totalorder %s45_s27, %s510_s30  ;;  %p516_p3 = scmp.lt.s32.totalorder %s510_s30, %s510_s30 }
  0x2a   :  { %p517_p4 = por %p516_p3, %p515_p2 }
  0x2c   :  { %p518_p5 = pnand %p517_p4, %p511_p1 }
  0x2e   :  { %521 = shalt.err (!%p518_p5)
}
  0x2f   :  { %50 = dma.hbm_to_vmem [thread:$0]  %s651_s2, 128, %s45_s27, [#allocation6], %s551_s20, %s551_s20, %s552_s21  }
  0x30   :  { %s530_s0 = scalar_lea.vmem %s71_s29, 1024  ;;  %p535_p7 = scmp.lt.s32.totalorder %s71_s29, %s71_s29 }
  0x31   :  { %p531_p6 = scmp.ne.s32.totalorder %s71_s29, %s530_s0  ;;  %p536_p8 = scmp.lt.s32.totalorder %s530_s0, %s530_s0 }
  0x33   :  { %p537_p9 = por %p536_p8, %p535_p7 }
  0x35   :  { %p538_p10 = pnand %p537_p9, %p531_p6 }
  0x37   :  { %541 = shalt.err (!%p538_p10)
}
  0x38   :  { %76 = dma.hbm_to_vmem [thread:$0]  %s654_s5, 1024, %s71_s29, [#allocation9], %s551_s20, %s551_s20, %s552_s21  }
  0x39   :  { %542 = dma.done.wait [#allocation4], 128  }
  0x3a   :  { %543 = vsyncadd [#allocation4], 4294967168 }
  0x3b   :  { %544 = dma.done.wait [#allocation6], 256  }
  0x3c   :  { %545 = vsyncadd [#allocation6], 4294967040 }
  0x3d   :  { %546 = dma.done.wait [#allocation9], 1152  }
  0x3e   :  { %547 = vsyncadd [#allocation9], 4294966144  ;;  %v555_v1 = vmov 0.0   ;;  %vm556_vm0 = vmmov 0   ;;  %vm116_vm1 = vcmask 1045504   ;;  %v101_v3 = vld [vmem:[#allocation5] sm:$0xff] }
  0x3f   :  { %391 = vmatprep.subr.bf16.mxu1 %v555_v1  ;;  %393 = vmatprep.mubr.msk.bf16.mxu1 %vm556_vm0, %v555_v1  ;;  %v432_v2 = vld [vmem:[#allocation8] sm:$0x3f]   ;;  %vm169_vm2 = vcmask 1044480   ;;  %v102_v5 = vpack.c.bf16 %v101_v3, %v101_v3  ;;  %v433_v6 = vld [vmem:[#allocation7] sm:$0x1f]   ;;  %vm112_vm3 = vcmask 97280  }
  0x40   :  { %403 = vmatprep.subr.bf16.mxu0 %v555_v1  ;;  %419 = vmatprep.mubr.msk.bf16.mxu0 %vm556_vm0, %v555_v1  ;;  %v118_v4 = vsel %vm116_vm1, %v432_v2, 0  ;;  %v434_v7 = vld [vmem:[#allocation10 + $0x38] sm:$0xff]   ;;  %v171_v8 = vsel %vm169_vm2, %v433_v6, 0  ;;  %v435_v9 = vld [vmem:[#allocation10 + $0x30] sm:$0xff]   ;;  %v99_v10 = vld [vmem:[#allocation3] sm:$0xff]  ;;  %vm165_vm4 = vcmask 80896  }
  0x41   :  { %392 = vmatpush3.bf16.msra.mxu1 %v118_v4  ;;  %404 = vmatpush3.bf16.msra.mxu0 %v434_v7  ;;  %v436_v11 = vld [vmem:[#allocation10 + $0x28] sm:$0xff]   ;;  %v100_v12 = vpack.c.bf16 %v99_v10, %v99_v10  ;;  %v437_v13 = vld [vmem:[#allocation10 + $0x20] sm:$0xff]   ;;  %v438_v14 = vld [vmem:[#allocation10 + $0x18] sm:$0xff]   ;;  %vm353_vm5 = vcmask 7168  }
  0x42   :  { %397 = vmatprep.subr.bf16.mxu1 %v555_v1  ;;  %405 = vmatprep.subr.bf16.mxu0 %v555_v1  ;;  %v439_v15 = vld [vmem:[#allocation10 + $0x10] sm:$0xff]   ;;  %v440_v16 = vld [vmem:[#allocation10 + $0x8] sm:$0xff]   ;;  %v441_v17 = vld [vmem:[#allocation10] sm:$0xff]  }
  0x43   :  { %v366_v23 = vld [vmem:[%s653_s4] ss:$0 sm:$0xff] }
  0x44   :  { %394 = vmatmul.mubr.msk.bf16.vlgmr.msra.gmra.mxu1 %vm112_vm3, %v102_v5  ;;  %v367_v31 = vld [vmem:[%s655_s6] ss:$0 sm:$0xff] }
  0x45   :  { %398 = vmatpush3.bf16.msra.mxu1 %v171_v8  ;;  %399 = vmatprep.mubr.msk.bf16.mxu1 %vm556_vm0, %v555_v1  ;;  %v376_v35 = vld [vmem:[%s656_s7] ss:$0 sm:$0xff] }
  0x46   :  { %406 = vmatpush3.bf16.msra.mxu0 %v435_v9  ;;  %v377_v40 = vld [vmem:[#allocation2] ss:$0 sm:$0xff] }
  0x47   :  { %407 = vmatprep.subr.bf16.mxu0 %v555_v1 }
  0x4a   :  { %408 = vmatpush3.bf16.msra.mxu0 %v436_v11 }
  0x4b   :  { %409 = vmatprep.subr.bf16.mxu0 %v555_v1 }
  0x4c   :  { %400 = vmatmul.mubr.msk.bf16.vlgmr.msra.gmra.mxu1 %vm165_vm4, %v100_v12 }
  0x4e   :  { %410 = vmatpush3.bf16.msra.mxu0 %v437_v13 }
  0x4f   :  { %411 = vmatprep.subr.bf16.mxu0 %v555_v1 }
  0x52   :  { %412 = vmatpush3.bf16.msra.mxu0 %v438_v14 }
  0x53   :  { %413 = vmatprep.subr.bf16.mxu0 %v555_v1 }
  0x56   :  { %414 = vmatpush3.bf16.msra.mxu0 %v439_v15 }
  0x57   :  { %415 = vmatprep.subr.bf16.mxu0 %v555_v1 }
  0x5a   :  { %416 = vmatpush3.bf16.msra.mxu0 %v440_v16 }
  0x5b   :  { %417 = vmatprep.subr.bf16.mxu0 %v555_v1 }
  0x5e   :  { %418 = vmatpush3.bf16.msra.mxu0 %v441_v17 }
 0x104   :  { %v154_v18 = vpop.f32.mrf.mxu1 }
 0x106   :  { %v395_v19 = vpop.f32.mrf.mxu1 }
 0x108   :  { %v157_v20 = vpop.f32.mrf.mxu1 }
 0x10a   :  { %v396_v21 = vpop.f32.mrf.mxu1 }
 0x10c   :  { %v207_v22 = vpop.f32.mrf.mxu1 }
 0x10d   :  { %v208_v24 = vadd.f32 %v207_v22, %v154_v18 }
 0x10e   :  { %v401_v25 = vpop.f32.mrf.mxu1 }
 0x10f   :  { %v220_v26 = vadd.f32 %v366_v23, %v208_v24 }
 0x110   :  { %v210_v27 = vpop.f32.mrf.mxu1 }
 0x111   :  { %v221_v28 = vmax.f32 %v220_v26, 0.0 }
 0x112   :  { %v402_v29 = vpop.f32.mrf.mxu1 }
 0x113   :  { %v222_v30 = vpack.c.bf16 %v221_v28, %v221_v28 }
 0x115   :  { %420 = vmatmul.mubr.bf16.vlgmr.msra.gmra.mxu0 %v222_v30 }
 0x1d5   :  { %v328_v32 = vpop.f32.mrf.mxu0 }
 0x1d6   :  { %v329_v33 = vadd.f32 %v367_v31, %v328_v32 }
 0x1d7   :  { %v421_v34 = vpop.f32.mrf.mxu0 }
 0x1d8   :  { %v334_v36 = vmax.f32 %v329_v33, 0.0 }
 0x1d9   :  { %v331_v37 = vpop.f32.mrf.mxu0 }
 0x1da   :  { %v342_v38 = vmul.f32 %v376_v35, %v334_v36 }
 0x1db   :  { %v422_v39 = vpop.f32.mrf.mxu0 }
 0x1dc   :  { %343 = vadd.xlane.f32.xlu0 %v342_v38 }
 0x265   :  { %v344_v41 = vpop.xlane.xlu0 %343 }
 0x266   :  { %v352_v42 = vadd.f32 %v377_v40, %v344_v41 }
 0x268   :  { %354 = vst.msk [vmem:[%s658_s9] sm:$0xff] %vm353_vm5, %v352_v42 }
 0x269   :  { %359 = vsyncpa [#allocation4], 1 }
 0x26a   :  { %360 = vsyncpa [#allocation6], 1 }
 0x26b   :  { %361 = vsyncpa [#allocation9], 1 }

</bundles_post_ra>
